<compile_context>
chip_gen: v7x
topology: tpu7x:2x2x1
jax: 0.10.0
libtpu: 0.0.40
codegen_flags: <defaults>
</compile_context>

<pallas_src>
import functools

import numpy as np
import jax
import jax.numpy as jnp
from jax import lax
from jax.experimental import pallas as pl
from jax.experimental.pallas import tpu as pltpu


def _round_up(v, m):
    return ((v + m - 1) // m) * m


# ------------------------------- Pallas kernel ------------------------------- #

def _ecc_fused_kernel(nbase_ref,                          # SMEM scalar prefetch: (num_tiles,) int32
                      eft_ref, xet_ref, seg_ref, inv_ref,  # per-edge tiles (edges on lanes)
                      w1t_ref, b1t_ref, w2t_ref, b2t_ref,  # resident filter-net params
                      out_ref,                             # resident (N_pad, Cout) accumulator
                      *, cin, cout, tw):
    t = pl.program_id(0)

    @pl.when(t == 0)
    def _init():
        out_ref[...] = jnp.zeros_like(out_ref)

    # ---- fused filter-generating MLP (transposed: edges on the 128-lane axis) ----
    h = jnp.dot(w1t_ref[...], eft_ref[...], preferred_element_type=jnp.float32) + b1t_ref[...]
    h = jnp.maximum(h, 0.0)                                                    # (H, TE)
    w = jnp.dot(w2t_ref[...], h, preferred_element_type=jnp.float32) + b2t_ref[...]   # (Cin*Cout, TE)

    # ---- per-edge matvec, lane-dense Cin-step multiply-accumulate ----
    # prod[o, e] = sum_c x[idxn[e], c] * W[e, c, o]
    xe = xet_ref[...]                                                          # (Cin, TE)
    prod = xe[0:1, :] * w[0:cout, :]
    for c in range(1, cin):
        prod = prod + xe[c:c + 1, :] * w[c * cout:(c + 1) * cout, :]
    prod = prod * inv_ref[...]                                                 # fold 1/deg -> (Cout, TE)

    # ---- segment (destination node) scatter-add into this tile's node window ----
    nbase = pl.multiple_of(nbase_ref[t], 8)                                    # 8-aligned window base
    seg_rel = seg_ref[...] - nbase                                             # (1, TE) int32
    te = seg_rel.shape[-1]
    rows = lax.broadcasted_iota(jnp.int32, (tw, te), 0)
    onehot = (rows == seg_rel).astype(jnp.float32)                             # (TW, TE), exact 0/1
    # contract over the edge (lane) axis of both operands -> (TW, Cout) on the MXU
    contrib = lax.dot_general(onehot, prod, (((1,), (1,)), ((), ())),
                              preferred_element_type=jnp.float32)
    out_ref[pl.ds(nbase, tw), :] += contrib


# -------------------------------- JAX wrapper -------------------------------- #

def graph_conv_forward(x, edgefeats, idxn, idxe, degs, fnet_params,
                       in_channels, out_channels, *, edge_tile=512):
    """Fused ECC forward (filter-net MLP + per-edge matvec + segment mean), one pallas_call."""
    w1, b1, w2, b2 = fnet_params
    degs = np.asarray(degs)
    n_nodes = int(degs.shape[0])

    if idxe is not None:
        # Dedup-weight indexing: expand edge features to per-edge rows (index glue).
        edgefeats = jnp.take(jnp.asarray(edgefeats), jnp.asarray(idxe, jnp.int32), axis=0)

    E = int(edgefeats.shape[0])
    if E == 0:
        return jnp.zeros((n_nodes, out_channels), jnp.float32)
    F = int(edgefeats.shape[1])
    H = int(w1.shape[1])
    cc = int(w2.shape[1])
    assert cc == in_channels * out_channels, "only the full-weight-matrix variant is implemented"
    assert int(idxn.shape[0]) == E

    TE = max(128, _round_up(int(edge_tile), 128))
    num_tiles = -(-E // TE)
    e_pad = num_tiles * TE

    # --- host-side graph structure (degs is host data, as in the PyTorch module) ---
    seg_np = np.repeat(np.arange(n_nodes, dtype=np.int64), degs)   # destination node per edge
    assert seg_np.shape[0] == E, "sum(degs) must equal number of edges"
    starts = np.arange(num_tiles, dtype=np.int64) * TE
    ends = np.minimum(starts + TE, E) - 1
    nbase = (seg_np[starts] // 8) * 8                              # 8-aligned window base per tile
    tw = int(np.max(seg_np[ends] - nbase + 1))                     # node-window size (static)
    tw = max(8, _round_up(tw, 8))
    n_pad = _round_up(n_nodes, 8) + tw                             # OOB-safe resident output rows

    inv_node = np.where(degs > 0, 1.0 / np.maximum(degs, 1), 0.0).astype(np.float32)
    inv_edge = inv_node[seg_np]                                    # 1/deg(dest) per edge

    # --- device-side per-edge operands, transposed (edges on lanes) & zero-padded to E_pad ---
    x = jnp.asarray(x, jnp.float32)
    pad = e_pad - E
    xet = jnp.pad(jnp.take(x, jnp.asarray(idxn, jnp.int32), axis=0).T, ((0, 0), (0, pad)))
    eft = jnp.pad(jnp.asarray(edgefeats, jnp.float32).T, ((0, 0), (0, pad)))
    seg = jnp.pad(jnp.asarray(seg_np, jnp.int32), (0, pad),
                  constant_values=np.int32(2 ** 30)).reshape(1, e_pad)   # pad edges never match a window
    inv = jnp.pad(jnp.asarray(inv_edge, jnp.float32), (0, pad)).reshape(1, e_pad)

    w1t = jnp.asarray(w1, jnp.float32).T                 # (H, F)
    b1t = jnp.asarray(b1, jnp.float32).reshape(-1, 1)    # (H, 1)
    w2t = jnp.asarray(w2, jnp.float32).T                 # (Cin*Cout, H)
    b2t = jnp.asarray(b2, jnp.float32).reshape(-1, 1)    # (Cin*Cout, 1)
    nbase_dev = jnp.asarray(nbase, jnp.int32)

    kernel = functools.partial(_ecc_fused_kernel, cin=in_channels, cout=out_channels, tw=tw)

    def edge_spec(block):
        return pl.BlockSpec(block, lambda t, nb: (0, t))

    def const_spec(block):
        return pl.BlockSpec(block, lambda t, nb: (0, 0))

    out_pad = pl.pallas_call(
        kernel,
        out_shape=jax.ShapeDtypeStruct((n_pad, out_channels), jnp.float32),
        grid_spec=pltpu.PrefetchScalarGridSpec(
            num_scalar_prefetch=1,                 # per-tile node-window bases (SMEM)
            grid=(num_tiles,),
            in_specs=[
                edge_spec((F, TE)),                # edge features^T        (pipelined)
                edge_spec((in_channels, TE)),      # gathered x rows^T      (pipelined)
                edge_spec((1, TE)),                # destination node ids   (pipelined)
                edge_spec((1, TE)),                # 1/deg per edge         (pipelined)
                const_spec((H, F)),                # w1^T   (VMEM resident)
                const_spec((H, 1)),                # b1^T
                const_spec((cc, H)),               # w2^T
                const_spec((cc, 1)),               # b2^T
            ],
            out_specs=pl.BlockSpec((n_pad, out_channels), lambda t, nb: (0, 0)),
        ),
        compiler_params=pltpu.CompilerParams(dimension_semantics=("arbitrary",)),
    )(nbase_dev, eft, xet, seg, inv, w1t, b1t, w2t, b2t)

    return out_pad[:n_nodes]


class GraphConvModule:
    """JAX/Pallas mirror of the PyTorch GraphConvModule (forward only, matrix-weight path)."""

    def __init__(self, in_channels, out_channels, fnet_params, gc_info=None, edge_tile=512):
        self._in_channels = in_channels
        self._out_channels = out_channels
        self._fnet_params = fnet_params
        self._edge_tile = edge_tile
        self.set_info(gc_info)

    def set_info(self, gc_info):
        self._gci = gc_info  # (idxn, idxe, degs, edgefeats)

    def __call__(self, x):
        idxn, idxe, degs, edgefeats = self._gci
        return graph_conv_forward(
            x, edgefeats, idxn, idxe, degs, self._fnet_params,
            self._in_channels, self._out_channels, edge_tile=self._edge_tile)


# --------------------------------- Reference --------------------------------- #

def _reference(x, edgefeats, idxn, degs, params, cin, cout):
    w1, b1, w2, b2 = (np.asarray(p, np.float32) for p in params)
    x = np.asarray(x, np.float32)
    ef = np.asarray(edgefeats, np.float32)
    idxn = np.asarray(idxn)
    degs = np.asarray(degs)
    h = np.maximum(ef @ w1 + b1, 0.0)
    W = (h @ w2 + b2).reshape(-1, cin, cout)
    xe = x[idxn]
    prod = np.einsum("ec,eco->eo", xe, W)
    out = np.zeros((degs.shape[0], cout), np.float32)
    k = 0
    for i, d in enumerate(degs):
        d = int(d)
        if d > 0:
            out[i] = prod[k:k + d].mean(axis=0)
        k += d
    return out


# ------------------------------------ Main ------------------------------------ #

if __name__ == "__main__":
    in_channels, out_channels = 4, 8
    edge_feat_dim, hidden = 6, 32

    # Graph structure: edges grouped consecutively by destination node.
    degs = np.array([2, 0, 3, 1, 2, 2, 1, 3, 0, 2, 1, 3], dtype=np.int32)  # N = 12
    n_nodes = degs.shape[0]
    E = int(degs.sum())  # 20

    key = jax.random.PRNGKey(0)
    k_x, k_ef, k_idx, k_w1, k_w2, k_b1, k_b2 = jax.random.split(key, 7)

    x = jax.random.normal(k_x, (n_nodes, in_channels), dtype=jnp.float32)
    edgefeats = jax.random.normal(k_ef, (E, edge_feat_dim), dtype=jnp.float32)
    idxn = jax.random.randint(k_idx, (E,), 0, n_nodes, dtype=jnp.int32)
    idxe = None  # weights already per-edge (no dedup indexing)

    # Filter-net parameters: Linear(F, H) -> ReLU -> Linear(H, Cin*Cout)
    w1 = 0.2 * jax.random.normal(k_w1, (edge_feat_dim, hidden), dtype=jnp.float32)
    b1 = 0.1 * jax.random.normal(k_b1, (1, hidden), dtype=jnp.float32)
    w2 = 0.2 * jax.random.normal(k_w2, (hidden, in_channels * out_channels), dtype=jnp.float32)
    b2 = 0.1 * jax.random.normal(k_b2, (1, in_channels * out_channels), dtype=jnp.float32)
    fnet_params = (w1, b1, w2, b2)

    module = GraphConvModule(
        in_channels, out_channels, fnet_params,
        gc_info=(idxn, idxe, degs, edgefeats), edge_tile=128)

    out = module(x)
    out = jax.block_until_ready(out)

    ref = _reference(x, edgefeats, idxn, degs, fnet_params, in_channels, out_channels)
    np.testing.assert_allclose(np.asarray(out), ref, rtol=1e-4, atol=1e-4)

    print("KERNEL_OK")
</pallas_src>

<mosaic_0001>
module attributes {stable_mosaic.version = 11 : i64} {
  func.func @_ecc_fused_kernel(%arg0: i32, %arg1: memref<1xi32, #tpu.memory_space<smem>>, %arg2: memref<6x128xf32, #tpu.memory_space<vmem>>, %arg3: memref<4x128xf32, #tpu.memory_space<vmem>>, %arg4: memref<1x128xi32, #tpu.memory_space<vmem>>, %arg5: memref<1x128xf32, #tpu.memory_space<vmem>>, %arg6: memref<32x6xf32, #tpu.memory_space<vmem>>, %arg7: memref<32x1xf32, #tpu.memory_space<vmem>>, %arg8: memref<32x32xf32, #tpu.memory_space<vmem>>, %arg9: memref<32x1xf32, #tpu.memory_space<vmem>>, %arg10: memref<32x8xf32, #tpu.memory_space<vmem>>) attributes {dimension_semantics = [#tpu.dimension_semantics<arbitrary>], iteration_bounds = array<i64: 1>, scalar_prefetch = 1 : i64, scratch_operands = 0 : i64, tpu.core_type = #tpu.core_type<tc>, window_params = [{transform_indices = @transform_0, window_bounds = array<i64: 6, 128>}, {transform_indices = @transform_1, window_bounds = array<i64: 4, 128>}, {transform_indices = @transform_2, window_bounds = array<i64: 1, 128>}, {transform_indices = @transform_3, window_bounds = array<i64: 1, 128>}, {pipeline_mode = #tpu.pipeline_mode<synchronous>, transform_indices = @transform_4, window_bounds = array<i64: 32, 6>}, {pipeline_mode = #tpu.pipeline_mode<synchronous>, transform_indices = @transform_5, window_bounds = array<i64: 32, 1>}, {pipeline_mode = #tpu.pipeline_mode<synchronous>, transform_indices = @transform_6, window_bounds = array<i64: 32, 32>}, {pipeline_mode = #tpu.pipeline_mode<synchronous>, transform_indices = @transform_7, window_bounds = array<i64: 32, 1>}, {pipeline_mode = #tpu.pipeline_mode<synchronous>, transform_indices = @transform_8, window_bounds = array<i64: 32, 8>}]} {
    %c0_i32 = arith.constant 0 : i32
    %0 = arith.cmpi eq, %arg0, %c0_i32 : i32
    %1 = arith.extui %0 : i1 to i32
    %c0_i32_0 = arith.constant 0 : i32
    %2 = arith.cmpi ne, %1, %c0_i32_0 : i32
    scf.if %2 {
      %cst_21 = arith.constant 0.000000e+00 : f32
      %56 = vector.broadcast %cst_21 : f32 to vector<32x8xf32>
      %c0_22 = arith.constant 0 : index
      %c0_23 = arith.constant 0 : index
      %57 = vector.load %arg10[%c0_22, %c0_23] : memref<32x8xf32, #tpu.memory_space<vmem>>, vector<32x8xf32>
      tpu.vector_store %arg10[%c0_22, %c0_23], %56 {strides = array<i32>} : memref<32x8xf32, #tpu.memory_space<vmem>>, vector<32x8xf32>,
    } else {
    }
    %c0 = arith.constant 0 : index
    %c0_1 = arith.constant 0 : index
    %3 = vector.load %arg6[%c0, %c0_1] : memref<32x6xf32, #tpu.memory_space<vmem>>, vector<32x6xf32>
    %c0_2 = arith.constant 0 : index
    %c0_3 = arith.constant 0 : index
    %4 = vector.load %arg2[%c0_2, %c0_3] : memref<6x128xf32, #tpu.memory_space<vmem>>, vector<6x128xf32>
    %cst = arith.constant dense<0.000000e+00> : vector<32x128xf32>
    %5 = tpu.matmul %3, %4, %cst {dimension_numbers = #tpu.dot_dimension_numbers<[1], [0], [0], [1], [0, 0, 1, 1], [], []>} : vector<32x6xf32>, vector<6x128xf32>, vector<32x128xf32> -> vector<32x128xf32>
    %c0_4 = arith.constant 0 : index
    %c0_5 = arith.constant 0 : index
    %6 = vector.load %arg7[%c0_4, %c0_5] : memref<32x1xf32, #tpu.memory_space<vmem>>, vector<32x1xf32>
    %7 = vector.broadcast %6 : vector<32x1xf32> to vector<32x128xf32>
    %8 = arith.addf %5, %7 : vector<32x128xf32>
    %cst_6 = arith.constant 0.000000e+00 : f32
    %9 = vector.broadcast %cst_6 : f32 to vector<32x128xf32>
    %10 = arith.maximumf %8, %9 : vector<32x128xf32>
    %c0_7 = arith.constant 0 : index
    %c0_8 = arith.constant 0 : index
    %11 = vector.load %arg8[%c0_7, %c0_8] : memref<32x32xf32, #tpu.memory_space<vmem>>, vector<32x32xf32>
    %cst_9 = arith.constant dense<0.000000e+00> : vector<32x128xf32>
    %12 = tpu.matmul %11, %10, %cst_9 {dimension_numbers = #tpu.dot_dimension_numbers<[1], [0], [0], [1], [0, 0, 1, 1], [], []>} : vector<32x32xf32>, vector<32x128xf32>, vector<32x128xf32> -> vector<32x128xf32>
    %c0_10 = arith.constant 0 : index
    %c0_11 = arith.constant 0 : index
    %13 = vector.load %arg9[%c0_10, %c0_11] : memref<32x1xf32, #tpu.memory_space<vmem>>, vector<32x1xf32>
    %14 = vector.broadcast %13 : vector<32x1xf32> to vector<32x128xf32>
    %15 = arith.addf %12, %14 : vector<32x128xf32>
    %c0_12 = arith.constant 0 : index
    %c0_13 = arith.constant 0 : index
    %16 = vector.load %arg3[%c0_12, %c0_13] : memref<4x128xf32, #tpu.memory_space<vmem>>, vector<4x128xf32>
    %17 = vector.extract_strided_slice %16 {offsets = [0, 0], sizes = [1, 128], strides = [1, 1]} : vector<4x128xf32> to vector<1x128xf32>
    %18 = vector.extract_strided_slice %15 {offsets = [0, 0], sizes = [8, 128], strides = [1, 1]} : vector<32x128xf32> to vector<8x128xf32>
    %19 = vector.broadcast %17 : vector<1x128xf32> to vector<8x128xf32>
    %20 = arith.mulf %19, %18 : vector<8x128xf32>
    %21 = vector.extract_strided_slice %16 {offsets = [1, 0], sizes = [1, 128], strides = [1, 1]} : vector<4x128xf32> to vector<1x128xf32>
    %22 = vector.extract_strided_slice %15 {offsets = [8, 0], sizes = [8, 128], strides = [1, 1]} : vector<32x128xf32> to vector<8x128xf32>
    %23 = vector.broadcast %21 : vector<1x128xf32> to vector<8x128xf32>
    %24 = arith.mulf %23, %22 : vector<8x128xf32>
    %25 = arith.addf %20, %24 : vector<8x128xf32>
    %26 = vector.extract_strided_slice %16 {offsets = [2, 0], sizes = [1, 128], strides = [1, 1]} : vector<4x128xf32> to vector<1x128xf32>
    %27 = vector.extract_strided_slice %15 {offsets = [16, 0], sizes = [8, 128], strides = [1, 1]} : vector<32x128xf32> to vector<8x128xf32>
    %28 = vector.broadcast %26 : vector<1x128xf32> to vector<8x128xf32>
    %29 = arith.mulf %28, %27 : vector<8x128xf32>
    %30 = arith.addf %25, %29 : vector<8x128xf32>
    %31 = vector.extract_strided_slice %16 {offsets = [3, 0], sizes = [1, 128], strides = [1, 1]} : vector<4x128xf32> to vector<1x128xf32>
    %32 = vector.extract_strided_slice %15 {offsets = [24, 0], sizes = [8, 128], strides = [1, 1]} : vector<32x128xf32> to vector<8x128xf32>
    %33 = vector.broadcast %31 : vector<1x128xf32> to vector<8x128xf32>
    %34 = arith.mulf %33, %32 : vector<8x128xf32>
    %35 = arith.addf %30, %34 : vector<8x128xf32>
    %c0_14 = arith.constant 0 : index
    %c0_15 = arith.constant 0 : index
    %36 = vector.load %arg5[%c0_14, %c0_15] : memref<1x128xf32, #tpu.memory_space<vmem>>, vector<1x128xf32>
    %37 = vector.broadcast %36 : vector<1x128xf32> to vector<8x128xf32>
    %38 = arith.mulf %35, %37 : vector<8x128xf32>
    %39 = arith.index_cast %arg0 : i32 to index
    %40 = memref.load %arg1[%39] : memref<1xi32, #tpu.memory_space<smem>>
    %41 = tpu.assume_multiple %40, 8 : i32
    %c0_16 = arith.constant 0 : index
    %c0_17 = arith.constant 0 : index
    %42 = vector.load %arg4[%c0_16, %c0_17] : memref<1x128xi32, #tpu.memory_space<vmem>>, vector<1x128xi32>
    %43 = vector.broadcast %41 : i32 to vector<1x128xi32>
    %44 = arith.subi %42, %43 : vector<1x128xi32>
    %45 = tpu.iota {dimensions = array<i32: 0>} : vector<16x128xi32>
    %46 = vector.broadcast %44 : vector<1x128xi32> to vector<16x128xi32>
    %47 = arith.cmpi eq, %45, %46 : vector<16x128xi32>
    %48 = arith.extui %47 : vector<16x128xi1> to vector<16x128xi32>
    %49 = arith.sitofp %48 : vector<16x128xi32> to vector<16x128xf32>
    %cst_18 = arith.constant dense<0.000000e+00> : vector<16x8xf32>
    %50 = tpu.matmul %49, %38, %cst_18 {dimension_numbers = #tpu.dot_dimension_numbers<[1], [1], [0], [0], [0, 0, 1, 0], [], []>} : vector<16x128xf32>, vector<8x128xf32>, vector<16x8xf32> -> vector<16x8xf32>
    %51 = arith.index_cast %41 : i32 to index
    %c0_19 = arith.constant 0 : index
    %52 = vector.load %arg10[%51, %c0_19] : memref<32x8xf32, #tpu.memory_space<vmem>>, vector<16x8xf32>
    %53 = arith.addf %52, %50 : vector<16x8xf32>
    %54 = arith.index_cast %41 : i32 to index
    %c0_20 = arith.constant 0 : index
    %55 = vector.load %arg10[%54, %c0_20] : memref<32x8xf32, #tpu.memory_space<vmem>>, vector<16x8xf32>
    tpu.vector_store %arg10[%54, %c0_20], %53 {strides = array<i32>} : memref<32x8xf32, #tpu.memory_space<vmem>>, vector<16x8xf32>,
    return
  }
  func.func @transform_0(%arg0: i32, %arg1: memref<1xi32, #tpu.memory_space<smem>>) -> (i32, i32) {
    %c0_i32 = arith.constant 0 : i32
    %c0_i32_0 = arith.constant 0 : i32
    return %c0_i32, %arg0 : i32, i32
  }
  func.func @transform_1(%arg0: i32, %arg1: memref<1xi32, #tpu.memory_space<smem>>) -> (i32, i32) {
    %c0_i32 = arith.constant 0 : i32
    %c0_i32_0 = arith.constant 0 : i32
    return %c0_i32, %arg0 : i32, i32
  }
  func.func @transform_2(%arg0: i32, %arg1: memref<1xi32, #tpu.memory_space<smem>>) -> (i32, i32) {
    %c0_i32 = arith.constant 0 : i32
    %c0_i32_0 = arith.constant 0 : i32
    return %c0_i32, %arg0 : i32, i32
  }
  func.func @transform_3(%arg0: i32, %arg1: memref<1xi32, #tpu.memory_space<smem>>) -> (i32, i32) {
    %c0_i32 = arith.constant 0 : i32
    %c0_i32_0 = arith.constant 0 : i32
    return %c0_i32, %arg0 : i32, i32
  }
  func.func @transform_4(%arg0: i32, %arg1: memref<1xi32, #tpu.memory_space<smem>>) -> (i32, i32) {
    %c0_i32 = arith.constant 0 : i32
    %c0_i32_0 = arith.constant 0 : i32
    %c0_i32_1 = arith.constant 0 : i32
    return %c0_i32, %c0_i32_0 : i32, i32
  }
  func.func @transform_5(%arg0: i32, %arg1: memref<1xi32, #tpu.memory_space<smem>>) -> (i32, i32) {
    %c0_i32 = arith.constant 0 : i32
    %c0_i32_0 = arith.constant 0 : i32
    %c0_i32_1 = arith.constant 0 : i32
    return %c0_i32, %c0_i32_0 : i32, i32
  }
  func.func @transform_6(%arg0: i32, %arg1: memref<1xi32, #tpu.memory_space<smem>>) -> (i32, i32) {
    %c0_i32 = arith.constant 0 : i32
    %c0_i32_0 = arith.constant 0 : i32
    %c0_i32_1 = arith.constant 0 : i32
    return %c0_i32, %c0_i32_0 : i32, i32
  }
  func.func @transform_7(%arg0: i32, %arg1: memref<1xi32, #tpu.memory_space<smem>>) -> (i32, i32) {
    %c0_i32 = arith.constant 0 : i32
    %c0_i32_0 = arith.constant 0 : i32
    %c0_i32_1 = arith.constant 0 : i32
    return %c0_i32, %c0_i32_0 : i32, i32
  }
  func.func @transform_8(%arg0: i32, %arg1: memref<1xi32, #tpu.memory_space<smem>>) -> (i32, i32) {
    %c0_i32 = arith.constant 0 : i32
    %c0_i32_0 = arith.constant 0 : i32
    %c0_i32_1 = arith.constant 0 : i32
    return %c0_i32, %c0_i32_0 : i32, i32
  }
}

</mosaic_0001>

<bundles_post_ra>
// kernel: tpu_custom_call.1
= control target key start
LH: loop header
LB: loop body
LE: loop exit
PB: predicated region body
PF: predicated region fallthrough
CT: control target
= control target key end

     0   :  { %vm82_vm0 = vcmask 1045504   ;;  %vm69_vm1 = vcmask 48128   ;;  %v508_v3 = vmov 0   ;;  %vm203_vm2 = vcmask 261120   ;;  %s657_s1 = inlined_call_operand.vmem [shape: f32[6,128], index: 1, kind: input, shape index: {}]   ;;  %s658_s5 = inlined_call_operand.vmem [shape: f32[32,6], index: 5, kind: input, shape index: {}]   ;;  %s659_s6 = inlined_call_operand.vmem [shape: f32[32,1], index: 6, kind: input, shape index: {}]   ;;  %s660_s8 = inlined_call_operand.vmem [shape: f32[32,1], index: 8, kind: input, shape index: {}]   ;;  %s661_s7 = inlined_call_operand.vmem [shape: f32[32,32], index: 7, kind: input, shape index: {}]   ;;  %s662_s0 = inlined_call_operand.<no memory space> [shape: s32[1], index: 0, kind: input, shape index: {}]   ;;  %s663_s3 = inlined_call_operand.vmem [shape: s32[1,128], index: 3, kind: input, shape index: {}]   ;;  %s664_s9 = inlined_call_operand.vmem [shape: f32[32,8], index: 9, kind: output, shape index: {}]   ;;  %s665_s2 = inlined_call_operand.vmem [shape: f32[4,128], index: 2, kind: input, shape index: {}]   ;;  %s666_s4 = inlined_call_operand.vmem [shape: f32[1,128], index: 4, kind: input, shape index: {}]  }
   0x1   :  { %v44_v0 = vld [vmem:[%s657_s1] sm:$0x3f]  ;;  %v41_v2 = vld [vmem:[%s658_s5 + $0x8] sm:$0xff]  ;;  %506 = vset.pattern.permute.xlu0 %v508_v3  ;;  %507 = vset.pattern.permute.xlu1 %v508_v3  ;;  %v42_v4 = vld [vmem:[%s658_s5 + $0x10] sm:$0xff]  ;;  %v302_v36 = vlaneseq  ;;  %v335_v39 = vstv %s662_s0  ;;  %v509_v44 = vmov 1.0   ;;  %vm35_vm5 = vcmask 64512   ;;  %s425_s11 = scalar_lea.vmem %s664_s9, %s662_s0 }
   0x2   :  { %v40_v1 = vld [vmem:[%s658_s5] sm:$0xff]  ;;  %468 = vmatprep.subr.msk.mxu0 %vm82_vm0, %v44_v0  ;;  %v47_v6 = vld [vmem:[%s659_s6 + $0x10] sm:$0xff]  ;;  %v46_v7 = vld [vmem:[%s659_s6 + $0x8] sm:$0xff]  ;;  %v510_v45 = vmov 0.0  }
   0x3   :  { %470 = vmatprep.mubr.msk.f32.mxu0 %vm69_vm1, %v40_v1  ;;  %v45_v5 = vld [vmem:[%s659_s6] sm:$0xff]  ;;  %469 = vmatpush3.msk.msra.mxu0 %vm82_vm0, %v44_v0  ;;  %v43_v8 = vld [vmem:[%s658_s5 + $0x18] sm:$0xff]  ;;  %v180_v11 = vld [vmem:[%s660_s8 + $0x8] sm:$0xff]  ;;  %v303_v37 = vshrl.u32 %v302_v36, 7  ;;  %36 = vst.msk [vmem:[%s664_s9] sm:$0xff] %vm35_vm5, %v510_v45 }
   0x4   :  { %51 = vperm.xlu0 %506, %v45_v5   ;;  %471 = vmatmul.mubr.msk.f32.vlgmr.msra.gmra.mrb[0].mxu0 %vm69_vm1, %v41_v2  ;;  %v48_v9 = vld [vmem:[%s659_s6 + $0x18] sm:$0xff]  ;;  %v179_v10 = vld [vmem:[%s660_s8] sm:$0xff]  ;;  %v181_v12 = vld [vmem:[%s660_s8 + $0x10] sm:$0xff]  ;;  %37 = vst.msk [vmem:[%s664_s9 + $0x8] sm:$0xff] %vm35_vm5, %v510_v45 }
   0x5   :  { %61 = vperm.xlu1 %507, %v47_v6   ;;  %473 = vmatprep.mubr.msk.f32.mxu0 %vm69_vm1, %v42_v4  ;;  %v182_v13 = vld [vmem:[%s660_s8 + $0x18] sm:$0xff]  ;;  %v175_v14 = vld [vmem:[%s661_s7] sm:$0xff]  ;;  %v176_v33 = vld [vmem:[%s661_s7 + $0x8] sm:$0xff]  ;;  %v304_v40 = vsub.s32 0, %v303_v37  ;;  %v339_v43 = vadd.s32 8, %v303_v37  ;;  %38 = vst.msk [vmem:[%s664_s9 + $0x10] sm:$0xff] %vm35_vm5, %v510_v45 }
   0x6   :  { %484 = vmatprep.mubr.msk.f32.mxu1 %vm203_vm2, %v175_v14  ;;  %v177_v34 = vld [vmem:[%s661_s7 + $0x10] sm:$0xff]  ;;  %v178_v35 = vld [vmem:[%s661_s7 + $0x18] sm:$0xff]  ;;  %v334_v38 = vld [vmem:[%s663_s3] sm:$0x1]  ;;  %39 = vst.msk [vmem:[%s664_s9 + $0x18] sm:$0xff] %vm35_vm5, %v510_v45  ;;  %v309_v46 = vsub.s32 1, %v303_v37 }
   0x7   :  { %v336_v41 = vsub.s32 %v334_v38, %v335_v39  ;;  %v301_v47 = vld [vmem:[%s665_s2] sm:$0xf]  ;;  %v321_v51 = vsub.s32 3, %v303_v37  ;;  %v315_v54 = vsub.s32 2, %v303_v37 }
   0x8   :  { %56 = vperm.xlu0 %506, %v46_v7   ;;  %474 = vmatmul.mubr.msk.f32.gmra.mrb[2].mxu0 %vm69_vm1, %v43_v8  ;;  %v310_v50 = vrot.slane %v301_v47, %v309_v46  ;;  %v305_v53 = vrot.slane %v301_v47, %v304_v40  ;;  %v447_v8 = vld [vmem:[%s666_s4] ss:$0 sm:$0xff] }
   0x9   :  { %66 = vperm.xlu1 %507, %v48_v9   ;;  %v343_v42 = vrot.slane %v336_v41, %v304_v40  ;;  %v322_v59 = vrot.slane %v301_v47, %v321_v51  ;;  %v316_v63 = vrot.slane %v301_v47, %v315_v54 }
   0xb   :  { %vm344_vm3 = vcmp.eq.s32.totalorder %v303_v37, %v343_v42  ;;  %vm345_vm4 = vcmp.eq.s32.totalorder %v339_v43, %v343_v42 }
   0xc   :  { %185 = vperm.xlu0 %506, %v179_v10   ;;  %492 = vmatprep.mubr.msk.f32.mxu0 %vm344_vm3, %v509_v44 }
   0xd   :  { %190 = vperm.xlu1 %507, %v180_v11   ;;  %v427_v11 = vld [vmem:[%s425_s11 + $0x8] sm:$0xff] }
  0x10   :  { %195 = vperm.xlu0 %506, %v181_v12   ;;  %v426_v12 = vld [vmem:[%s425_s11] sm:$0xff] }
  0x11   :  { %200 = vperm.xlu1 %507, %v182_v13  }
  0x83   :  { %v52_v15 = vpop.permute.xlu0 %51 }
  0x84   :  { %v62_v16 = vpop.permute.xlu1 %61 }
  0x87   :  { %v57_v17 = vpop.permute.xlu0 %56 }
  0x88   :  { %v67_v23 = vpop.permute.xlu1 %66 }
  0x8b   :  { %v186_v49 = vpop.permute.xlu0 %185 }
  0x8c   :  { %v191_v48 = vpop.permute.xlu1 %190 }
  0x8f   :  { %v196_v0 = vpop.permute.xlu0 %195 }
  0x90   :  { %v201_v60 = vpop.permute.xlu1 %200 }
  0xd7   :  { %v472_v18 = vpop.f32.mrb[0].mxu0 }
  0xd8   :  { %v158_v19 = vadd.f32 %v472_v18, %v57_v17  ;;  %v152_v20 = vpop.f32.mrb[1].mxu0 }
  0xd9   :  { %v153_v21 = vadd.f32 %v152_v20, %v52_v15 }
  0xda   :  { %v172_v22 = vmax.f32 %v158_v19, 0.0 }
  0xdb   :  { %v171_v24 = vmax.f32 %v153_v21, 0.0  ;;  %v475_v25 = vpop.f32.mrb[2].mxu0 }
  0xdc   :  { %v168_v26 = vadd.f32 %v475_v25, %v67_v23  ;;  %v162_v27 = vpop.f32.mrb[3].mxu0 }
  0xdd   :  { %v163_v28 = vadd.f32 %v162_v27, %v62_v16  ;;  %v495_v29 = vpack.c.bf16 %v172_v22, %v171_v24 }
  0xde   :  { %v174_v30 = vmax.f32 %v168_v26, 0.0 }
  0xdf   :  { %v173_v31 = vmax.f32 %v163_v28, 0.0  ;;  %496 = vmatprep.subr.bf16.mxu1 %v495_v29 }
  0xe0   :  { %498 = vmatpush3.bf16.msra.mxu1 %v495_v29 }
  0xe1   :  { %v499_v32 = vpack.c.bf16 %v174_v30, %v173_v31 }
  0xe3   :  { %500 = vmatprep.subr.bf16.mxu1 %v499_v32 }
  0xe4   :  { %502 = vmatpush3.bf16.msra.mxu1 %v499_v32 }
  0xe7   :  { %485 = vmatmul.mubr.msk.f32.vlgmr.msra.gmra.mrb[0].mxu1 %vm203_vm2, %v176_v33 }
  0xe8   :  { %487 = vmatprep.mubr.msk.f32.mxu1 %vm203_vm2, %v177_v34 }
  0xeb   :  { %488 = vmatmul.mubr.msk.f32.gmra.mrb[2].mxu1 %vm203_vm2, %v178_v35 }
 0x1ba   :  { %v486_v52 = vpop.f32.mrb[0].mxu1 }
 0x1bb   :  { %v288_v55 = vadd.f32 %v486_v52, %v191_v48  ;;  %v282_v56 = vpop.f32.mrb[1].mxu1 }
 0x1bc   :  { %v283_v57 = vadd.f32 %v282_v56, %v186_v49 }
 0x1bd   :  { %v311_v58 = vmul.f32 %v310_v50, %v288_v55 }
 0x1be   :  { %v306_v61 = vmul.f32 %v305_v53, %v283_v57  ;;  %v489_v62 = vpop.f32.mrb[2].mxu1 }
 0x1bf   :  { %v298_v1 = vadd.f32 %v489_v62, %v201_v60  ;;  %v292_v2 = vpop.f32.mrb[3].mxu1 }
 0x1c0   :  { %v312_v3 = vadd.f32 %v311_v58, %v306_v61  ;;  %v293_v4 = vadd.f32 %v292_v2, %v196_v0 }
 0x1c1   :  { %v323_v5 = vmul.f32 %v322_v59, %v298_v1 }
 0x1c2   :  { %v317_v6 = vmul.f32 %v316_v63, %v293_v4 }
 0x1c4   :  { %v318_v7 = vadd.f32 %v317_v6, %v312_v3 }
 0x1c6   :  { %v324_v9 = vadd.f32 %v323_v5, %v318_v7 }
 0x1c8   :  { %v332_v10 = vmul.f32 %v447_v8, %v324_v9 }
 0x1ca   :  { %490 = vmatprep.subr.mxu0 %v332_v10 }
 0x1cb   :  { %491 = vmatpush3.xpose.msra.mxu0 %v332_v10 }
 0x1ce   :  { %493 = vmatmul.mubr.msk.f32.vlgmr.msra.gmra.mrb[4].mxu0 %vm345_vm4, %v509_v44 }
 0x2a1   :  { %v494_v13 = vpop.f32.mrb[4].mxu0 }
 0x2a2   :  { %v429_v14 = vadd.f32 %v494_v13, %v427_v11  ;;  %v416_v15 = vpop.f32.mrb[5].mxu0 }
 0x2a3   :  { %v428_v16 = vadd.f32 %v426_v12, %v416_v15 }
 0x2a4   :  { %432 = vst.msk [vmem:[%s425_s11 + $0x8] sm:$0xff] %vm35_vm5, %v429_v14 }
 0x2a5   :  { %431 = vst.msk [vmem:[%s425_s11] sm:$0xff] %vm35_vm5, %v428_v16 }

</bundles_post_ra>
